<compile_context>
chip_gen: v5e
topology: v5e:2x2
jax: 0.10.0
libtpu: 0.0.40
codegen_flags: <defaults>
</compile_context>

<pallas_src>
import functools

import jax
import jax.numpy as jnp
from jax.experimental import pallas as pl
from jax.experimental.pallas import tpu as pltpu


def _shifted(x2, s, l_ids, L):
    """Rows shifted by s within each length-L segment, zero outside [0, L).

    x2:     (R, C) with R = BT*L; row r holds sequence position r % L.
    result: result[r, :] = x2[r + s, :] if 0 <= (r % L) + s < L else 0.
    The roll wraps across segment/block boundaries, but those wrapped rows are
    exactly the ones the boundary mask zeroes, so no batch element ever reads
    a neighbour's (or an out-of-bounds partial block's) rows.
    """
    if s == 0:
        return x2
    R = x2.shape[0]
    rolled = pltpu.roll(x2, (-s) % R, 0)          # XLU sublane rotate
    valid = (l_ids + s >= 0) & (l_ids + s < L)    # conv "same" zero-padding rows
    return jnp.where(valid, rolled, 0).astype(x2.dtype)


def _conv1d_kernel(x_ref, w_ref, b_ref, o_ref, *, fuse_taps):
    # x_ref: (BT, L, C_in)    input block (no pre-padding; halo handled here)
    # w_ref: (K*C_in, C_out)  fused conv weights, tap-major rows
    # b_ref: (1, C_out)       bias
    # o_ref: (BT, L, C_out)   output block
    BT, L, C_in = x_ref.shape
    KC, C_out = w_ref.shape
    K = KC // C_in
    pad = (K - 1) // 2

    x2 = x_ref[...].reshape(BT * L, C_in)         # free merge (L % 8 == 0)
    # Sequence position of each row; built once, reused by every tap mask.
    l_ids = jax.lax.broadcasted_iota(jnp.int32, (BT, L, C_in), 1).reshape(BT * L, C_in)

    if fuse_taps:
        # One MXU push with contraction K*C_in.
        slabs = [_shifted(x2, t - pad, l_ids, L) for t in range(K)]
        lhs = jnp.concatenate(slabs, axis=-1)     # (BT*L, K*C_in), lane concat
        acc = jnp.dot(lhs.astype(w_ref.dtype), w_ref[...],
                      preferred_element_type=jnp.float32)
    else:
        # K accumulating dots: no K*C_in LHS buffer (better for large C_in).
        acc = jnp.zeros((BT * L, C_out), jnp.float32)
        for t in range(K):
            slab = _shifted(x2, t - pad, l_ids, L)
            acc = acc + jnp.dot(slab.astype(w_ref.dtype),
                                w_ref[t * C_in:(t + 1) * C_in, :],
                                preferred_element_type=jnp.float32)

    acc = acc + b_ref[...].astype(jnp.float32)    # single bias add per block
    o_ref[...] = acc.reshape(BT, L, C_out).astype(o_ref.dtype)


def _vmem_plan():
    """Return (per-step block budget, vmem_limit_bytes), sized per TPU generation."""
    cap = None
    try:
        cap = getattr(pltpu.get_tpu_info(), "vmem_capacity_bytes", None)
    except Exception:
        cap = None
    if not cap:
        cap = 64 * 1024 * 1024                    # conservative: v7x per-TC VMEM
    if cap >= 128 * 1024 * 1024:                  # v5e / v6e (128 MiB physical)
        return 24 * 1024 * 1024, 96 * 1024 * 1024
    return 14 * 1024 * 1024, 48 * 1024 * 1024     # v7x-class (64 MiB per TC)


def _pick_batch_tile(B, L, C_in, C_out, K, itemsize, budget_bytes, fuse_taps):
    """Batch elements per grid step, counting in-kernel f32 transients too."""
    per_b = (2 * itemsize * L * (C_in + C_out)              # double-buffered in/out blocks
             + 4 * L * K * C_in * (2 if fuse_taps else 1)   # f32 shifted slabs (+ fused LHS)
             + 4 * L * 2 * C_out)                           # f32 accumulator + store temp
    return int(max(1, min(B, budget_bytes // max(per_b, 1))))


def conv_max_pool_forward(x, weight, bias, *, use_bf16=False,
                          fuse_taps=None, batch_tile=None):
    """x: (B, L, C_in); weight: (C_out, C_in, K) [PyTorch layout]; bias: (C_out,).

    Returns (B, L, C_out), matching ConvMaxPool.forward.
    """
    B, L, C_in = x.shape
    C_out, C_in_w, K = weight.shape
    assert C_in_w == C_in, "weight C_in mismatch"
    # The module hardcodes padding=1; that equals "same" padding only for k=3.
    assert K == 3, "ConvMaxPool uses padding=1, which only matches 'same' conv for k=3"

    # Pad L (with zeros) to a multiple of 8 so in-kernel reshapes never cross
    # the (8,128) sublane tile.  The extra zero rows reproduce the conv's own
    # zero padding, so slicing them off afterwards is exact.
    Lk = L + ((-L) % 8)
    if Lk != L:
        x = jnp.pad(x, ((0, 0), (0, Lk - L), (0, 0)))

    # Fused weight: (K, C_in, C_out) tap-major -> (K*C_in, C_out).
    w_fused = jnp.transpose(weight, (2, 1, 0)).reshape(K * C_in, C_out)
    if use_bf16:
        # bf16 MXU operands (v6e/v7x are bf16-native); accumulation stays f32.
        w_fused = w_fused.astype(jnp.bfloat16)
    b2d = bias.reshape(1, C_out)

    if fuse_taps is None:
        # Fuse the taps while the fused depth still fits one MXU pass.
        fuse_taps = (K * C_in) <= 256

    budget, vmem_limit = _vmem_plan()
    itemsize = jnp.dtype(x.dtype).itemsize
    BT = batch_tile or _pick_batch_tile(B, Lk, C_in, C_out, K, itemsize, budget, fuse_taps)
    BT = int(min(BT, B))
    grid = (pl.cdiv(B, BT),)   # partial last block OK: batch rows are independent

    kernel = functools.partial(_conv1d_kernel, fuse_taps=fuse_taps)

    out = pl.pallas_call(
        kernel,
        out_shape=jax.ShapeDtypeStruct((B, Lk, C_out), x.dtype),
        grid_spec=pltpu.PrefetchScalarGridSpec(
            num_scalar_prefetch=0,
            grid=grid,
            in_specs=[
                pl.BlockSpec((BT, Lk, C_in), lambda b: (b, 0, 0)),
                pl.BlockSpec((K * C_in, C_out), lambda b: (0, 0)),
                pl.BlockSpec((1, C_out), lambda b: (0, 0)),
            ],
            out_specs=pl.BlockSpec((BT, Lk, C_out), lambda b: (b, 0, 0)),
        ),
        compiler_params=pltpu.CompilerParams(
            dimension_semantics=("parallel",),
            vmem_limit_bytes=vmem_limit,
        ),
    )(x, w_fused, b2d)

    if Lk != L:
        out = out[:, :L, :]
    return out


def _reference(x, weight, bias):
    # Pure-JAX reference of Conv1d(k=3, stride=1, padding=1) in (B,L,C) layout.
    K = weight.shape[2]
    pad = (K - 1) // 2
    xp = jnp.pad(x, ((0, 0), (pad, pad), (0, 0)))
    L = x.shape[1]
    w_tap = jnp.transpose(weight, (2, 1, 0))  # (K, C_in, C_out)
    out = jnp.zeros((x.shape[0], L, weight.shape[0]), jnp.float32)
    for t in range(K):
        out = out + jnp.einsum("blc,co->blo", xp[:, t:t + L, :], w_tap[t])
    return out + bias[None, None, :]


if __name__ == "__main__":
    key = jax.random.PRNGKey(0)

    def make_case(k, B, L, C_in, C_out, K=3):
        k_x, k_w, k_b = jax.random.split(k, 3)
        x = jax.random.normal(k_x, (B, L, C_in), dtype=jnp.float32)
        bound = float((C_in * K) ** -0.5)  # mimic nn.Conv1d default init range
        w = jax.random.uniform(k_w, (C_out, C_in, K), jnp.float32, -bound, bound)
        b = jax.random.uniform(k_b, (C_out,), jnp.float32, -bound, bound)
        return x, w, b

    k1, k2, k3 = jax.random.split(key, 3)

    # Case 1: small CHARM-like config; fused-tap path, single block.
    x, w, b = make_case(k1, B=2, L=16, C_in=4, C_out=8)
    out = jax.block_until_ready(conv_max_pool_forward(x, w, b))
    ref = _reference(x, w, b)
    assert out.shape == (2, 16, 8)
    assert jnp.allclose(out, ref.astype(out.dtype), atol=1e-5, rtol=1e-5)

    # Case 2: per-tap-dot path + L not a multiple of 8 (exercises L padding).
    x, w, b = make_case(k2, B=2, L=10, C_in=4, C_out=8)
    out = jax.block_until_ready(conv_max_pool_forward(x, w, b, fuse_taps=False))
    assert jnp.allclose(out, _reference(x, w, b).astype(out.dtype), atol=1e-5, rtol=1e-5)

    # Case 3: partial last batch block (grid = cdiv(3, 2) = 2 steps).
    x, w, b = make_case(k3, B=3, L=16, C_in=4, C_out=8)
    out = jax.block_until_ready(conv_max_pool_forward(x, w, b, batch_tile=2))
    assert jnp.allclose(out, _reference(x, w, b).astype(out.dtype), atol=1e-5, rtol=1e-5)

    # TODO(synk): AdaptiveMaxPool1d(1) is declared in __init__ but unused in
    # ConvMaxPool.forward, so it is deliberately not implemented here.
    print("KERNEL_OK")
</pallas_src>

<mosaic_0001>
module attributes {stable_mosaic.version = 11 : i64} {
  func.func @_conv1d_kernel(%arg0: i32, %arg1: memref<2x16x4xf32, #tpu.memory_space<vmem>>, %arg2: memref<12x8xf32, #tpu.memory_space<vmem>>, %arg3: memref<1x8xf32, #tpu.memory_space<vmem>>, %arg4: memref<2x16x8xf32, #tpu.memory_space<vmem>>) attributes {dimension_semantics = [#tpu.dimension_semantics<parallel>], iteration_bounds = array<i64: 1>, scalar_prefetch = 0 : i64, scratch_operands = 0 : i64, tpu.core_type = #tpu.core_type<tc>, window_params = [{transform_indices = @transform_0, window_bounds = array<i64: 2, 16, 4>}, {pipeline_mode = #tpu.pipeline_mode<synchronous>, transform_indices = @transform_1, window_bounds = array<i64: 12, 8>}, {pipeline_mode = #tpu.pipeline_mode<synchronous>, transform_indices = @transform_2, window_bounds = array<i64: 1, 8>}, {transform_indices = @transform_3, window_bounds = array<i64: 2, 16, 8>}]} {
    %c0 = arith.constant 0 : index
    %c0_0 = arith.constant 0 : index
    %c0_1 = arith.constant 0 : index
    %0 = vector.load %arg1[%c0, %c0_0, %c0_1] : memref<2x16x4xf32, #tpu.memory_space<vmem>>, vector<2x16x4xf32>
    %1 = vector.shape_cast %0 : vector<2x16x4xf32> to vector<32x4xf32>
    %2 = tpu.iota {dimensions = array<i32: 1>} : vector<2x16x4xi32>
    %3 = vector.shape_cast %2 : vector<2x16x4xi32> to vector<32x4xi32>
    %c1_i32 = arith.constant 1 : i32
    %4 = tpu.dynamic_rotate %1 by %c1_i32 dim 0 : vector<32x4xf32>, i32 -> vector<32x4xf32>
    %c-1_i32 = arith.constant -1 : i32
    %5 = vector.broadcast %c-1_i32 : i32 to vector<32x4xi32>
    %6 = arith.addi %3, %5 : vector<32x4xi32>
    %c0_i32 = arith.constant 0 : i32
    %7 = vector.broadcast %c0_i32 : i32 to vector<32x4xi32>
    %8 = arith.cmpi sge, %6, %7 : vector<32x4xi32>
    %c-1_i32_2 = arith.constant -1 : i32
    %9 = vector.broadcast %c-1_i32_2 : i32 to vector<32x4xi32>
    %10 = arith.addi %3, %9 : vector<32x4xi32>
    %c16_i32 = arith.constant 16 : i32
    %11 = vector.broadcast %c16_i32 : i32 to vector<32x4xi32>
    %12 = arith.cmpi slt, %10, %11 : vector<32x4xi32>
    %13 = arith.andi %8, %12 : vector<32x4xi1>
    %c0_i32_3 = arith.constant 0 : i32
    %14 = arith.sitofp %c0_i32_3 : i32 to f32
    %15 = vector.broadcast %14 : f32 to vector<32x4xf32>
    %16 = arith.select %13, %4, %15 : vector<32x4xi1>, vector<32x4xf32>
    %c31_i32 = arith.constant 31 : i32
    %17 = tpu.dynamic_rotate %1 by %c31_i32 dim 0 : vector<32x4xf32>, i32 -> vector<32x4xf32>
    %c1_i32_4 = arith.constant 1 : i32
    %18 = vector.broadcast %c1_i32_4 : i32 to vector<32x4xi32>
    %19 = arith.addi %3, %18 : vector<32x4xi32>
    %c0_i32_5 = arith.constant 0 : i32
    %20 = vector.broadcast %c0_i32_5 : i32 to vector<32x4xi32>
    %21 = arith.cmpi sge, %19, %20 : vector<32x4xi32>
    %c1_i32_6 = arith.constant 1 : i32
    %22 = vector.broadcast %c1_i32_6 : i32 to vector<32x4xi32>
    %23 = arith.addi %3, %22 : vector<32x4xi32>
    %c16_i32_7 = arith.constant 16 : i32
    %24 = vector.broadcast %c16_i32_7 : i32 to vector<32x4xi32>
    %25 = arith.cmpi slt, %23, %24 : vector<32x4xi32>
    %26 = arith.andi %21, %25 : vector<32x4xi1>
    %c0_i32_8 = arith.constant 0 : i32
    %27 = arith.sitofp %c0_i32_8 : i32 to f32
    %28 = vector.broadcast %27 : f32 to vector<32x4xf32>
    %29 = arith.select %26, %17, %28 : vector<32x4xi1>, vector<32x4xf32>
    %30 = tpu.concatenate %16, %1, %29 in 1 : vector<32x4xf32>, vector<32x4xf32>, vector<32x4xf32> -> vector<32x12xf32>
    %c0_9 = arith.constant 0 : index
    %c0_10 = arith.constant 0 : index
    %31 = vector.load %arg2[%c0_9, %c0_10] : memref<12x8xf32, #tpu.memory_space<vmem>>, vector<12x8xf32>
    %cst = arith.constant dense<0.000000e+00> : vector<32x8xf32>
    %32 = tpu.matmul %30, %31, %cst {dimension_numbers = #tpu.dot_dimension_numbers<[1], [0], [0], [1], [0, 0, 1, 1], [], []>} : vector<32x12xf32>, vector<12x8xf32>, vector<32x8xf32> -> vector<32x8xf32>
    %c0_11 = arith.constant 0 : index
    %c0_12 = arith.constant 0 : index
    %33 = vector.load %arg3[%c0_11, %c0_12] : memref<1x8xf32, #tpu.memory_space<vmem>>, vector<1x8xf32>
    %34 = vector.broadcast %33 : vector<1x8xf32> to vector<32x8xf32>
    %35 = arith.addf %32, %34 : vector<32x8xf32>
    %36 = vector.shape_cast %35 : vector<32x8xf32> to vector<2x16x8xf32>
    %c0_13 = arith.constant 0 : index
    %c0_14 = arith.constant 0 : index
    %c0_15 = arith.constant 0 : index
    %37 = vector.load %arg4[%c0_13, %c0_14, %c0_15] : memref<2x16x8xf32, #tpu.memory_space<vmem>>, vector<2x16x8xf32>
    tpu.vector_store %arg4[%c0_13, %c0_14, %c0_15], %36 {strides = array<i32>} : memref<2x16x8xf32, #tpu.memory_space<vmem>>, vector<2x16x8xf32>,
    return
  }
  func.func @transform_0(%arg0: i32) -> (i32, i32, i32) {
    %c0_i32 = arith.constant 0 : i32
    %c0_i32_0 = arith.constant 0 : i32
    %c0_i32_1 = arith.constant 0 : i32
    return %arg0, %c0_i32, %c0_i32_0 : i32, i32, i32
  }
  func.func @transform_1(%arg0: i32) -> (i32, i32) {
    %c0_i32 = arith.constant 0 : i32
    %c0_i32_0 = arith.constant 0 : i32
    %c0_i32_1 = arith.constant 0 : i32
    return %c0_i32, %c0_i32_0 : i32, i32
  }
  func.func @transform_2(%arg0: i32) -> (i32, i32) {
    %c0_i32 = arith.constant 0 : i32
    %c0_i32_0 = arith.constant 0 : i32
    %c0_i32_1 = arith.constant 0 : i32
    return %c0_i32, %c0_i32_0 : i32, i32
  }
  func.func @transform_3(%arg0: i32) -> (i32, i32, i32) {
    %c0_i32 = arith.constant 0 : i32
    %c0_i32_0 = arith.constant 0 : i32
    %c0_i32_1 = arith.constant 0 : i32
    return %arg0, %c0_i32, %c0_i32_0 : i32, i32, i32
  }
}

</mosaic_0001>

<bundles_post_ra>
// kernel: tpu_custom_call.1
= control target key start
LH: loop header
LB: loop body
LE: loop exit
PB: predicated region body
PF: predicated region fallthrough
CT: control target
= control target key end

     0   :  { %v18_v0 = vlaneseq  ;;  %s179_s18 = smov 4   ;;  %s180_s19 = smov 8   ;;  %vm124_vm4 = vcmask 1043456   ;;  %vm95_vm5 = vcmask 31744   ;;  %vm100_vm6 = vcmask 64512   ;;  %s284_s0 = inlined_call_operand.vmem [shape: f32[2,16,4], index: 0, kind: input, shape index: {}]   ;;  %s285_s2 = inlined_call_operand.vmem [shape: f32[1,8], index: 2, kind: input, shape index: {}]   ;;  %s286_s1 = inlined_call_operand.vmem [shape: f32[12,8], index: 1, kind: input, shape index: {}]   ;;  %s287_s3 = inlined_call_operand.vmem [shape: f32[2,16,8], index: 3, kind: output, shape index: {}]  }
   0x1   :  { %v16_v1 = vld [vmem:[%s284_s0 + $0x10] sm:$0xff]  ;;  %v207_v2 = vld [vmem:[%s284_s0 + $0x18] sm:$0xff]  ;;  %v212_v3 = vld [vmem:[%s284_s0] sm:$0xff]  ;;  %vm111_vm7 = vcmask 97280  }
   0x2   :  { %71 = vrot.lane.b32.xlu0 %v16_v1, %s179_s18  ;;  %v44_v4 = vrot.slane %v16_v1, 1  ;;  %v214_v5 = vshrl.u32 %v18_v0, 7  ;;  %v45_v6 = vrot.slane %v207_v2, 1  ;;  %67 = vrot.lane.b32.xlu2 %v212_v3, %s179_s18  ;;  %v42_v8 = vrot.slane %v212_v3, 1  ;;  %v15_v12 = vld [vmem:[%s284_s0 + $0x8] sm:$0xff]  ;;  %v105_v24 = vld [vmem:[%s286_s1] sm:$0xff] }
   0x3   :  { %v43_v14 = vrot.slane %v15_v12, 1  ;;  %v23_v19 = vrot.slane %v16_v1, 7  ;;  %v22_v20 = vrot.slane %v15_v12, 7  ;;  %v106_v21 = vld [vmem:[%s286_s1 + $0x8] sm:$0xf]  ;;  %v24_v25 = vrot.slane %v207_v2, 7 }
   0x4   :  { %vm46_vm0 = vcmp.lt.s32.totalorder %v214_v5, 7  ;;  %v20_v7 = vadd.s32 8, %v214_v5  ;;  %v30_v18 = vadd.s32 4294967295, %v214_v5  ;;  %vm25_vm2 = vcmp.lt.s32.totalorder %v214_v5, 1  ;;  %171 = vmatpush.msk.msra.mxu2 %vm124_vm4, %v106_v21  ;;  %172 = vmatpush.msk.msra.mxu3 %vm124_vm4, %v106_v21  ;;  %v178_v47 = vld [vmem:[%s285_s2] ss:$0 sm:$0xff] }
   0x5   :  { %v47_v9 = vsel %vm46_vm0, %v44_v4, %v45_v6  ;;  %v50_v11 = vsel %vm46_vm0, %v45_v6, %v42_v8  ;;  %v49_v15 = vsel %vm46_vm0, %v42_v8, %v43_v14  ;;  %v48_v16 = vsel %vm46_vm0, %v43_v14, %v44_v4  ;;  %165 = vmatpush.msk.msra.mxu0 %vm124_vm4, %v106_v21 }
   0x6   :  { %87 = vrot.lane.b32.xlu1 %v47_v9, %s180_s19  ;;  %v52_v10 = vadd.s32 1, %v20_v7  ;;  %vm32_vm3 = vcmp.ge.s32.totalorder %v30_v18, 0  ;;  %v27_v22 = vsel %vm25_vm2, %v22_v20, %v23_v19  ;;  %170 = vmatpush.msk.msra.mxu1 %vm124_vm4, %v106_v21  ;;  %v26_v26 = vsel %vm25_vm2, %v23_v19, %v24_v25 }
   0x7   :  { %v40_v23 = vsel %vm32_vm3, %v27_v22, 0.0  ;;  %174 = vmatpush.msra.mxu2 %v105_v24  ;;  %175 = vmatpush.msra.mxu3 %v105_v24  ;;  %v21_v32 = vrot.slane %v212_v3, 7 }
   0x8   :  { %vm56_vm1 = vcmp.lt.s32.totalorder %v52_v10, 16  ;;  %143 = vmatpush.msra.mxu0 %v105_v24  ;;  %173 = vmatpush.msra.mxu1 %v105_v24 }
   0x9   :  { %v62_v13 = vsel %vm56_vm1, %v50_v11, 0.0  ;;  %v60_v17 = vsel %vm56_vm1, %v48_v16, 0.0  ;;  %v29_v35 = vsel %vm25_vm2, %v24_v25, %v21_v32  ;;  %v28_v40 = vsel %vm25_vm2, %v21_v32, %v22_v20 }
   0xa   :  { %73 = vrot.lane.b32.xlu0 %v207_v2, %s179_s18  ;;  %69 = vrot.lane.b32.xlu2 %v15_v12, %s179_s18  ;;  %v38_v37 = vsel %vm32_vm3, %v29_v35, 0.0 }
   0xe   :  { %89 = vrot.lane.b32.xlu1 %v62_v13, %s180_s19 }
  0x12   :  { %83 = vrot.lane.b32.xlu0 %v49_v15, %s180_s19 }
  0x16   :  { %85 = vrot.lane.b32.xlu1 %v60_v17, %s180_s19 }
  0x5c   :  { %v68_v31 = vpop.permute.xlu2 %67 }
  0x5d   :  { %v96_v41 = vsel %vm95_vm5, %v38_v37, %v68_v31 }
  0x64   :  { %v70_v39 = vpop.permute.xlu2 %69 }
  0x65   :  { %v97_v44 = vsel %vm95_vm5, %v28_v40, %v70_v39 }
  0x74   :  { %v72_v27 = vpop.permute.xlu0 %71 }
  0x75   :  { %v98_v28 = vsel %vm95_vm5, %v40_v23, %v72_v27 }
  0x78   :  { %v88_v29 = vpop.permute.xlu1 %87 }
  0x79   :  { %v103_v30 = vsel %vm100_vm6, %v98_v28, %v88_v29 }
  0x7a   :  { %168 = vmatmul.msk.f32.vlgmr.msra.gmra.mxu2 %vm111_vm7, %v103_v30 }
  0x7c   :  { %v74_v33 = vpop.permute.xlu0 %73 }
  0x7d   :  { %v99_v34 = vsel %vm95_vm5, %v26_v26, %v74_v33 }
  0x80   :  { %v90_v36 = vpop.permute.xlu1 %89 }
  0x81   :  { %v104_v38 = vsel %vm100_vm6, %v99_v34, %v90_v36 }
  0x82   :  { %169 = vmatmul.msk.f32.vlgmr.msra.gmra.mxu3 %vm111_vm7, %v104_v38 }
  0x84   :  { %v84_v42 = vpop.permute.xlu0 %83 }
  0x85   :  { %v101_v43 = vsel %vm100_vm6, %v96_v41, %v84_v42 }
  0x86   :  { %166 = vmatmul.msk.f32.vlgmr.msra.gmra.mxu0 %vm111_vm7, %v101_v43 }
  0x88   :  { %v86_v45 = vpop.permute.xlu1 %85 }
  0x89   :  { %v102_v46 = vsel %vm100_vm6, %v97_v44, %v86_v45 }
  0x8a   :  { %167 = vmatmul.msk.f32.vlgmr.msra.gmra.mxu1 %vm111_vm7, %v102_v46 }
  0xfd   :  { %v151_v48 = vpop.f32.mrf.mxu2 }
  0xfe   :  { %v152_v49 = vadd.f32 %v178_v47, %v151_v48 }
 0x100   :  { %159 = vst.msk [vmem:[%s287_s3 + $0x10] sm:$0xff] %vm100_vm6, %v152_v49 }
 0x103   :  { %v145_v50 = vpop.f32.mrf.mxu0 }
 0x104   :  { %v146_v51 = vadd.f32 %v178_v47, %v145_v50 }
 0x105   :  { %v154_v52 = vpop.f32.mrf.mxu3 }
 0x106   :  { %157 = vst.msk [vmem:[%s287_s3] sm:$0xff] %vm100_vm6, %v146_v51  ;;  %v155_v53 = vadd.f32 %v178_v47, %v154_v52 }
 0x107   :  { %v148_v54 = vpop.f32.mrf.mxu1 }
 0x108   :  { %160 = vst.msk [vmem:[%s287_s3 + $0x18] sm:$0xff] %vm100_vm6, %v155_v53  ;;  %v149_v55 = vadd.f32 %v178_v47, %v148_v54 }
 0x10a   :  { %158 = vst.msk [vmem:[%s287_s3 + $0x8] sm:$0xff] %vm100_vm6, %v149_v55 }

</bundles_post_ra>
